<compile_context>
chip_gen: v5e
topology: v5e:2x2
jax: 0.10.0
libtpu: 0.0.40
codegen_flags: <defaults>
</compile_context>

<pallas_src>
import functools
import math

import jax
import jax.numpy as jnp
from jax.experimental import pallas as pl
from jax.experimental.pallas import tpu as pltpu


def _mlp_multi_fourier_kernel(x_ref, Ball_ref, w0s_ref, w0c_ref, b0_ref,
                              w1_ref, b1_ref, wf_ref, bf_ref, out_ref, *,
                              n_scales, n_hidden_layers, mapping_size):
    # x_ref:   (TM, n_input)
    # Ball_ref:(n_input, n_scales*mapping)
    # w0s_ref / w0c_ref: (mapping, n_hidden)      b0_ref: (1, n_hidden)
    # w1_ref:  (n_hidden_layers, n_hidden, n_hidden)
    # b1_ref:  (n_hidden_layers, 1, n_hidden)
    # wf_ref:  (n_scales, n_hidden, n_output)     bf_ref: (1, n_output)
    x = x_ref[...]                                             # (TM, n_input)

    # Fused Fourier projection across all scales: one K=n_input MXU matmul
    # with a lane-wide (n_scales*mapping) result instead of n_scales thin ones.
    proj = 2.0 * math.pi * jnp.dot(x, Ball_ref[...],
                                   preferred_element_type=jnp.float32)
    sin_all = jnp.sin(proj)                                    # (TM, S*map)
    cos_all = jnp.cos(proj)

    # Hoisted loads / broadcasts (reused across the unrolled scale loop).
    w0s = w0s_ref[...]
    w0c = w0c_ref[...]
    b0 = b0_ref[...]
    w1 = [w1_ref[l] for l in range(n_hidden_layers)]
    b1 = [b1_ref[l] for l in range(n_hidden_layers)]

    acc = jnp.zeros(out_ref.shape, dtype=jnp.float32)          # (TM, n_output)
    for s in range(n_scales):                                  # small static unroll
        lo = s * mapping_size
        hi = lo + mapping_size
        # concat([sin, cos]) @ w0  ==  sin @ w0_sin + cos @ w0_cos
        h = jnp.tanh(
            jnp.dot(sin_all[:, lo:hi], w0s, preferred_element_type=jnp.float32)
            + jnp.dot(cos_all[:, lo:hi], w0c, preferred_element_type=jnp.float32)
            + b0)
        for l in range(n_hidden_layers):
            h = jnp.tanh(
                jnp.dot(h, w1[l], preferred_element_type=jnp.float32) + b1[l])
        # Per-scale accumulation == block-row matmul of the scale-major concat.
        acc = acc + jnp.dot(h, wf_ref[s], preferred_element_type=jnp.float32)

    out_ref[...] = (acc + bf_ref[...]).astype(out_ref.dtype)


def mlp_multi_fourier(x, B, w0, b0, w1, b1, wf, bf, *, block_rows=256):
    """x: (batch, seq, n_input); B: (n_scales, mapping, n_input) PyTorch buffer;
    all linear weights stored (in_features, out_features)."""
    batch, seq, n_input = x.shape
    M = batch * seq
    n_scales, mapping_size, _ = B.shape
    n_hidden = w0.shape[1]
    n_hidden_layers = w1.shape[0]
    n_output = wf.shape[1]

    # Layout plumbing (wrapper-side, traced once).
    x2 = x.reshape(M, n_input)
    # B_all[i, s*map + j] = B[s, j, i]  so  x @ B_all == concat_s(x @ B[s].T)
    B_all = jnp.transpose(B, (2, 0, 1)).reshape(n_input, n_scales * mapping_size)
    w0_sin = w0[:mapping_size]
    w0_cos = w0[mapping_size:]
    wf3 = wf.reshape(n_scales, n_hidden, n_output)

    # Row tile: 8-aligned, capped at block_rows; pad M so the grid divides it.
    tm = min(block_rows, max(8, ((M + 7) // 8) * 8))
    m_pad = ((M + tm - 1) // tm) * tm
    if m_pad != M:
        x2 = jnp.pad(x2, ((0, m_pad - M), (0, 0)))

    kernel = functools.partial(_mlp_multi_fourier_kernel,
                               n_scales=n_scales,
                               n_hidden_layers=n_hidden_layers,
                               mapping_size=mapping_size)

    resident2 = lambda shape: pl.BlockSpec(shape, lambda i: (0, 0))
    resident3 = lambda shape: pl.BlockSpec(shape, lambda i: (0, 0, 0))

    out = pl.pallas_call(
        kernel,
        out_shape=jax.ShapeDtypeStruct((m_pad, n_output), jnp.float32),
        grid=(m_pad // tm,),
        in_specs=[
            pl.BlockSpec((tm, n_input), lambda i: (i, 0)),            # x tile
            resident2((n_input, n_scales * mapping_size)),            # B_all
            resident2((mapping_size, n_hidden)),                      # w0_sin
            resident2((mapping_size, n_hidden)),                      # w0_cos
            resident2((1, n_hidden)),                                 # b0
            resident3((n_hidden_layers, n_hidden, n_hidden)),         # w1
            resident3((n_hidden_layers, 1, n_hidden)),                # b1
            resident3((n_scales, n_hidden, n_output)),                # wf
            resident2((1, n_output)),                                 # bf
        ],
        out_specs=pl.BlockSpec((tm, n_output), lambda i: (i, 0)),
        compiler_params=pltpu.CompilerParams(
            dimension_semantics=("parallel",),
            vmem_limit_bytes=32 * 1024 * 1024),
    )(x2, B_all, w0_sin, w0_cos, b0, w1, b1, wf3, bf)

    return out[:M].reshape(batch, seq, n_output)


def reference_forward(x, B, w0, b0, w1, b1, wf, bf):
    """Pure-JAX mirror of the PyTorch forward (gamma/beta = None)."""
    batch, seq, n_input = x.shape
    xf = x.reshape(-1, n_input)                                   # (M, n_input)
    # x.view(-1, n) @ transpose(B, 1, 2) -> (n_scales, M, mapping)
    tmp = 2.0 * math.pi * jnp.einsum("mi,sji->smj", xf, B)
    tmp = jnp.concatenate([jnp.sin(tmp), jnp.cos(tmp)], axis=-1)
    tmp = jnp.tanh(tmp @ w0 + b0)
    for l in range(w1.shape[0]):
        tmp = jnp.tanh(tmp @ w1[l] + b1[l])
    # transpose(0,1) then view(batch, seq, n_scales*n_hidden)
    tmp = jnp.transpose(tmp, (1, 0, 2)).reshape(batch, seq, -1)
    return tmp @ wf + bf


if __name__ == "__main__":
    # Module hyper-parameters (small, consistent with __init__).
    n_input = 4
    n_output = 8
    n_hidden = 32
    n_hidden_layers = 1
    mapping_size = 32
    sigma = jnp.array([3.0, 1.0], dtype=jnp.float32)[:, None]    # (n_scales, 1)
    n_scales = sigma.shape[0]

    batch, seq = 2, 8

    key = jax.random.PRNGKey(0)
    kx, kB, k0, k1, kf = jax.random.split(key, 5)

    # Inputs.
    x = jax.random.normal(kx, (batch, seq, n_input), dtype=jnp.float32)

    # Fourier projection buffer B: (n_scales, mapping_size, n_input) * sigma.
    B = jax.random.normal(kB, (n_scales, mapping_size, n_input),
                          dtype=jnp.float32) * sigma[:, None, :]

    # Deterministic synthetic weights, stored (in_features, out_features).
    w0 = jax.random.normal(k0, (2 * mapping_size, n_hidden),
                           dtype=jnp.float32) * 0.1
    b0 = jnp.zeros((1, n_hidden), dtype=jnp.float32)
    w1 = jax.random.normal(k1, (n_hidden_layers, n_hidden, n_hidden),
                           dtype=jnp.float32) * 0.1
    b1 = jnp.zeros((n_hidden_layers, 1, n_hidden), dtype=jnp.float32)
    wf = jax.random.normal(kf, (n_scales * n_hidden, n_output),
                           dtype=jnp.float32) * 0.1
    bf = jnp.zeros((1, n_output), dtype=jnp.float32)

    out = jax.block_until_ready(mlp_multi_fourier(x, B, w0, b0, w1, b1, wf, bf))
    ref = reference_forward(x, B, w0, b0, w1, b1, wf, bf)

    assert out.shape == (batch, seq, n_output), out.shape
    assert jnp.allclose(out, ref, rtol=1e-5, atol=1e-5), "mismatch vs JAX reference"

    print("KERNEL_OK")
</pallas_src>

<mosaic_0001>
module attributes {stable_mosaic.version = 11 : i64} {
  func.func @_mlp_multi_fourier_kernel(%arg0: i32, %arg1: memref<16x4xf32, #tpu.memory_space<vmem>>, %arg2: memref<4x64xf32, #tpu.memory_space<vmem>>, %arg3: memref<32x32xf32, #tpu.memory_space<vmem>>, %arg4: memref<32x32xf32, #tpu.memory_space<vmem>>, %arg5: memref<1x32xf32, #tpu.memory_space<vmem>>, %arg6: memref<1x32x32xf32, #tpu.memory_space<vmem>>, %arg7: memref<1x1x32xf32, #tpu.memory_space<vmem>>, %arg8: memref<2x32x8xf32, #tpu.memory_space<vmem>>, %arg9: memref<1x8xf32, #tpu.memory_space<vmem>>, %arg10: memref<16x8xf32, #tpu.memory_space<vmem>>) attributes {dimension_semantics = [#tpu.dimension_semantics<parallel>], iteration_bounds = array<i64: 1>, scalar_prefetch = 0 : i64, scratch_operands = 0 : i64, tpu.core_type = #tpu.core_type<tc>, window_params = [{transform_indices = @transform_0, window_bounds = array<i64: 16, 4>}, {pipeline_mode = #tpu.pipeline_mode<synchronous>, transform_indices = @transform_1, window_bounds = array<i64: 4, 64>}, {pipeline_mode = #tpu.pipeline_mode<synchronous>, transform_indices = @transform_2, window_bounds = array<i64: 32, 32>}, {pipeline_mode = #tpu.pipeline_mode<synchronous>, transform_indices = @transform_3, window_bounds = array<i64: 32, 32>}, {pipeline_mode = #tpu.pipeline_mode<synchronous>, transform_indices = @transform_4, window_bounds = array<i64: 1, 32>}, {pipeline_mode = #tpu.pipeline_mode<synchronous>, transform_indices = @transform_5, window_bounds = array<i64: 1, 32, 32>}, {pipeline_mode = #tpu.pipeline_mode<synchronous>, transform_indices = @transform_6, window_bounds = array<i64: 1, 1, 32>}, {pipeline_mode = #tpu.pipeline_mode<synchronous>, transform_indices = @transform_7, window_bounds = array<i64: 2, 32, 8>}, {pipeline_mode = #tpu.pipeline_mode<synchronous>, transform_indices = @transform_8, window_bounds = array<i64: 1, 8>}, {transform_indices = @transform_9, window_bounds = array<i64: 16, 8>}]} {
    %c0 = arith.constant 0 : index
    %c0_0 = arith.constant 0 : index
    %0 = vector.load %arg1[%c0, %c0_0] : memref<16x4xf32, #tpu.memory_space<vmem>>, vector<16x4xf32>
    %c0_1 = arith.constant 0 : index
    %c0_2 = arith.constant 0 : index
    %1 = vector.load %arg2[%c0_1, %c0_2] : memref<4x64xf32, #tpu.memory_space<vmem>>, vector<4x64xf32>
    %cst = arith.constant dense<0.000000e+00> : vector<16x64xf32>
    %2 = tpu.matmul %0, %1, %cst {dimension_numbers = #tpu.dot_dimension_numbers<[1], [0], [0], [1], [0, 0, 1, 1], [], []>} : vector<16x4xf32>, vector<4x64xf32>, vector<16x64xf32> -> vector<16x64xf32>
    %cst_3 = arith.constant 6.28318548 : f32
    %3 = vector.broadcast %cst_3 : f32 to vector<16x64xf32>
    %4 = arith.mulf %3, %2 : vector<16x64xf32>
    %5 = math.sin %4 : vector<16x64xf32>
    %6 = math.cos %4 : vector<16x64xf32>
    %c0_4 = arith.constant 0 : index
    %c0_5 = arith.constant 0 : index
    %7 = vector.load %arg3[%c0_4, %c0_5] : memref<32x32xf32, #tpu.memory_space<vmem>>, vector<32x32xf32>
    %c0_6 = arith.constant 0 : index
    %c0_7 = arith.constant 0 : index
    %8 = vector.load %arg4[%c0_6, %c0_7] : memref<32x32xf32, #tpu.memory_space<vmem>>, vector<32x32xf32>
    %c0_8 = arith.constant 0 : index
    %c0_9 = arith.constant 0 : index
    %9 = vector.load %arg5[%c0_8, %c0_9] : memref<1x32xf32, #tpu.memory_space<vmem>>, vector<1x32xf32>
    %c0_10 = arith.constant 0 : index
    %c0_11 = arith.constant 0 : index
    %c0_12 = arith.constant 0 : index
    %10 = vector.load %arg6[%c0_10, %c0_11, %c0_12] : memref<1x32x32xf32, #tpu.memory_space<vmem>>, vector<1x32x32xf32>
    %11 = vector.shape_cast %10 : vector<1x32x32xf32> to vector<32x32xf32>
    %c0_13 = arith.constant 0 : index
    %c0_14 = arith.constant 0 : index
    %c0_15 = arith.constant 0 : index
    %12 = vector.load %arg7[%c0_13, %c0_14, %c0_15] : memref<1x1x32xf32, #tpu.memory_space<vmem>>, vector<1x1x32xf32>
    %13 = vector.shape_cast %12 : vector<1x1x32xf32> to vector<1x32xf32>
    %cst_16 = arith.constant 0.000000e+00 : f32
    %14 = vector.broadcast %cst_16 : f32 to vector<16x8xf32>
    %15 = vector.extract_strided_slice %5 {offsets = [0, 0], sizes = [16, 32], strides = [1, 1]} : vector<16x64xf32> to vector<16x32xf32>
    %cst_17 = arith.constant dense<0.000000e+00> : vector<16x32xf32>
    %16 = tpu.matmul %15, %7, %cst_17 {dimension_numbers = #tpu.dot_dimension_numbers<[1], [0], [0], [1], [0, 0, 1, 1], [], []>} : vector<16x32xf32>, vector<32x32xf32>, vector<16x32xf32> -> vector<16x32xf32>
    %17 = vector.extract_strided_slice %6 {offsets = [0, 0], sizes = [16, 32], strides = [1, 1]} : vector<16x64xf32> to vector<16x32xf32>
    %cst_18 = arith.constant dense<0.000000e+00> : vector<16x32xf32>
    %18 = tpu.matmul %17, %8, %cst_18 {dimension_numbers = #tpu.dot_dimension_numbers<[1], [0], [0], [1], [0, 0, 1, 1], [], []>} : vector<16x32xf32>, vector<32x32xf32>, vector<16x32xf32> -> vector<16x32xf32>
    %19 = arith.addf %16, %18 : vector<16x32xf32>
    %20 = vector.broadcast %9 : vector<1x32xf32> to vector<16x32xf32>
    %21 = arith.addf %19, %20 : vector<16x32xf32>
    %22 = math.tanh %21 : vector<16x32xf32>
    %cst_19 = arith.constant dense<0.000000e+00> : vector<16x32xf32>
    %23 = tpu.matmul %22, %11, %cst_19 {dimension_numbers = #tpu.dot_dimension_numbers<[1], [0], [0], [1], [0, 0, 1, 1], [], []>} : vector<16x32xf32>, vector<32x32xf32>, vector<16x32xf32> -> vector<16x32xf32>
    %24 = vector.broadcast %13 : vector<1x32xf32> to vector<16x32xf32>
    %25 = arith.addf %23, %24 : vector<16x32xf32>
    %26 = math.tanh %25 : vector<16x32xf32>
    %c0_20 = arith.constant 0 : index
    %c0_21 = arith.constant 0 : index
    %c0_22 = arith.constant 0 : index
    %27 = vector.load %arg8[%c0_20, %c0_21, %c0_22] : memref<2x32x8xf32, #tpu.memory_space<vmem>>, vector<1x32x8xf32>
    %28 = vector.shape_cast %27 : vector<1x32x8xf32> to vector<32x8xf32>
    %cst_23 = arith.constant dense<0.000000e+00> : vector<16x8xf32>
    %29 = tpu.matmul %26, %28, %cst_23 {dimension_numbers = #tpu.dot_dimension_numbers<[1], [0], [0], [1], [0, 0, 1, 1], [], []>} : vector<16x32xf32>, vector<32x8xf32>, vector<16x8xf32> -> vector<16x8xf32>
    %30 = arith.addf %14, %29 : vector<16x8xf32>
    %31 = vector.extract_strided_slice %5 {offsets = [0, 32], sizes = [16, 32], strides = [1, 1]} : vector<16x64xf32> to vector<16x32xf32>
    %cst_24 = arith.constant dense<0.000000e+00> : vector<16x32xf32>
    %32 = tpu.matmul %31, %7, %cst_24 {dimension_numbers = #tpu.dot_dimension_numbers<[1], [0], [0], [1], [0, 0, 1, 1], [], []>} : vector<16x32xf32>, vector<32x32xf32>, vector<16x32xf32> -> vector<16x32xf32>
    %33 = vector.extract_strided_slice %6 {offsets = [0, 32], sizes = [16, 32], strides = [1, 1]} : vector<16x64xf32> to vector<16x32xf32>
    %cst_25 = arith.constant dense<0.000000e+00> : vector<16x32xf32>
    %34 = tpu.matmul %33, %8, %cst_25 {dimension_numbers = #tpu.dot_dimension_numbers<[1], [0], [0], [1], [0, 0, 1, 1], [], []>} : vector<16x32xf32>, vector<32x32xf32>, vector<16x32xf32> -> vector<16x32xf32>
    %35 = arith.addf %32, %34 : vector<16x32xf32>
    %36 = vector.broadcast %9 : vector<1x32xf32> to vector<16x32xf32>
    %37 = arith.addf %35, %36 : vector<16x32xf32>
    %38 = math.tanh %37 : vector<16x32xf32>
    %cst_26 = arith.constant dense<0.000000e+00> : vector<16x32xf32>
    %39 = tpu.matmul %38, %11, %cst_26 {dimension_numbers = #tpu.dot_dimension_numbers<[1], [0], [0], [1], [0, 0, 1, 1], [], []>} : vector<16x32xf32>, vector<32x32xf32>, vector<16x32xf32> -> vector<16x32xf32>
    %40 = vector.broadcast %13 : vector<1x32xf32> to vector<16x32xf32>
    %41 = arith.addf %39, %40 : vector<16x32xf32>
    %42 = math.tanh %41 : vector<16x32xf32>
    %c1 = arith.constant 1 : index
    %c0_27 = arith.constant 0 : index
    %c0_28 = arith.constant 0 : index
    %43 = vector.load %arg8[%c1, %c0_27, %c0_28] : memref<2x32x8xf32, #tpu.memory_space<vmem>>, vector<1x32x8xf32>
    %44 = vector.shape_cast %43 : vector<1x32x8xf32> to vector<32x8xf32>
    %cst_29 = arith.constant dense<0.000000e+00> : vector<16x8xf32>
    %45 = tpu.matmul %42, %44, %cst_29 {dimension_numbers = #tpu.dot_dimension_numbers<[1], [0], [0], [1], [0, 0, 1, 1], [], []>} : vector<16x32xf32>, vector<32x8xf32>, vector<16x8xf32> -> vector<16x8xf32>
    %46 = arith.addf %30, %45 : vector<16x8xf32>
    %c0_30 = arith.constant 0 : index
    %c0_31 = arith.constant 0 : index
    %47 = vector.load %arg9[%c0_30, %c0_31] : memref<1x8xf32, #tpu.memory_space<vmem>>, vector<1x8xf32>
    %48 = vector.broadcast %47 : vector<1x8xf32> to vector<16x8xf32>
    %49 = arith.addf %46, %48 : vector<16x8xf32>
    %c0_32 = arith.constant 0 : index
    %c0_33 = arith.constant 0 : index
    %50 = vector.load %arg10[%c0_32, %c0_33] : memref<16x8xf32, #tpu.memory_space<vmem>>, vector<16x8xf32>
    tpu.vector_store %arg10[%c0_32, %c0_33], %49 {strides = array<i32>} : memref<16x8xf32, #tpu.memory_space<vmem>>, vector<16x8xf32>,
    return
  }
  func.func @transform_0(%arg0: i32) -> (i32, i32) {
    %c0_i32 = arith.constant 0 : i32
    %c0_i32_0 = arith.constant 0 : i32
    return %arg0, %c0_i32 : i32, i32
  }
  func.func @transform_1(%arg0: i32) -> (i32, i32) {
    %c0_i32 = arith.constant 0 : i32
    %c0_i32_0 = arith.constant 0 : i32
    %c0_i32_1 = arith.constant 0 : i32
    return %c0_i32, %c0_i32_0 : i32, i32
  }
  func.func @transform_2(%arg0: i32) -> (i32, i32) {
    %c0_i32 = arith.constant 0 : i32
    %c0_i32_0 = arith.constant 0 : i32
    %c0_i32_1 = arith.constant 0 : i32
    return %c0_i32, %c0_i32_0 : i32, i32
  }
  func.func @transform_3(%arg0: i32) -> (i32, i32) {
    %c0_i32 = arith.constant 0 : i32
    %c0_i32_0 = arith.constant 0 : i32
    %c0_i32_1 = arith.constant 0 : i32
    return %c0_i32, %c0_i32_0 : i32, i32
  }
  func.func @transform_4(%arg0: i32) -> (i32, i32) {
    %c0_i32 = arith.constant 0 : i32
    %c0_i32_0 = arith.constant 0 : i32
    %c0_i32_1 = arith.constant 0 : i32
    return %c0_i32, %c0_i32_0 : i32, i32
  }
  func.func @transform_5(%arg0: i32) -> (i32, i32, i32) {
    %c0_i32 = arith.constant 0 : i32
    %c0_i32_0 = arith.constant 0 : i32
    %c0_i32_1 = arith.constant 0 : i32
    %c0_i32_2 = arith.constant 0 : i32
    return %c0_i32, %c0_i32_0, %c0_i32_1 : i32, i32, i32
  }
  func.func @transform_6(%arg0: i32) -> (i32, i32, i32) {
    %c0_i32 = arith.constant 0 : i32
    %c0_i32_0 = arith.constant 0 : i32
    %c0_i32_1 = arith.constant 0 : i32
    %c0_i32_2 = arith.constant 0 : i32
    return %c0_i32, %c0_i32_0, %c0_i32_1 : i32, i32, i32
  }
  func.func @transform_7(%arg0: i32) -> (i32, i32, i32) {
    %c0_i32 = arith.constant 0 : i32
    %c0_i32_0 = arith.constant 0 : i32
    %c0_i32_1 = arith.constant 0 : i32
    %c0_i32_2 = arith.constant 0 : i32
    return %c0_i32, %c0_i32_0, %c0_i32_1 : i32, i32, i32
  }
  func.func @transform_8(%arg0: i32) -> (i32, i32) {
    %c0_i32 = arith.constant 0 : i32
    %c0_i32_0 = arith.constant 0 : i32
    %c0_i32_1 = arith.constant 0 : i32
    return %c0_i32, %c0_i32_0 : i32, i32
  }
  func.func @transform_9(%arg0: i32) -> (i32, i32) {
    %c0_i32 = arith.constant 0 : i32
    %c0_i32_0 = arith.constant 0 : i32
    return %arg0, %c0_i32 : i32, i32
  }
}

</mosaic_0001>

<bundles_post_ra>
// kernel: tpu_custom_call.1
= control target key start
LH: loop header
LB: loop body
LE: loop exit
PB: predicated region body
PF: predicated region fallthrough
CT: control target
= control target key end

     0   :  { %14 = vsyncpa [#allocation3], 0  ;;  %s1089_s12 = smov [#allocation2]   ;;  %s1090_s14 = smov 128   ;;  %s1432_s0 = inlined_call_operand.vmem [shape: f32[16,4], index: 0, kind: input, shape index: {}]   ;;  %s1433_s1 = inlined_call_operand.vmem [shape: f32[4,64], index: 1, kind: input, shape index: {}]   ;;  %s1434_s2 = inlined_call_operand.vmem [shape: f32[32,32], index: 2, kind: input, shape index: {}]   ;;  %s1435_s3 = inlined_call_operand.vmem [shape: f32[32,32], index: 3, kind: input, shape index: {}]   ;;  %s1436_s4 = inlined_call_operand.vmem [shape: f32[1,32], index: 4, kind: input, shape index: {}]   ;;  %s1437_s5 = inlined_call_operand.hbm [shape: f32[1,32,32], index: 5, kind: input, shape index: {}]   ;;  %s1438_s6 = inlined_call_operand.vmem [shape: f32[1,1,32], index: 6, kind: input, shape index: {}]   ;;  %s1439_s7 = inlined_call_operand.vmem [shape: f32[2,32,8], index: 7, kind: input, shape index: {}]   ;;  %s1440_s8 = inlined_call_operand.vmem [shape: f32[1,8], index: 8, kind: input, shape index: {}]   ;;  %s1441_s9 = inlined_call_operand.vmem [shape: f32[16,8], index: 9, kind: output, shape index: {}]  }
   0x1   :  { %s29_s11 = sshll.u32 %s1437_s5, 4  ;;  %s31_s13 = sshll.u32 %s1089_s12, 4  ;;  %s30_s11 = int_to_ptr.hbm [resolvable:$true] %s29_s11  ;;  %s32_s13 = int_to_ptr.vmem [resolvable:$true] %s31_s13 }
   0x2   :  { %s1091_s15 = smov 8  }
   0x3   :  { %37 = dma.hbm_to_vmem [thread:$0]  %s30_s11, 512, %s32_s13, [#allocation3], %s1090_s14, %s1090_s14, %s1091_s15  }
   0x4   :  { %1087 = dma.done.wait [#allocation3], 512  }
   0x5   :  { %1088 = vsyncadd [#allocation3], 4294966784  ;;  %vm58_vm0 = vcmask 1043456   ;;  %vm51_vm1 = vcmask 31744   ;;  %v50_v0 = vld [vmem:[%s1433_s1] sm:$0xf] }
   0x6   :  { %v48_v1 = vld [vmem:[%s1432_s0] sm:$0xff]  ;;  %v49_v2 = vld [vmem:[%s1432_s0 + $0x8] sm:$0xff]  ;;  %997 = vmatpush.msk.msra.mxu0 %vm58_vm0, %v50_v0  ;;  %1032 = vmatpush.msk.msra.mxu1 %vm58_vm0, %v50_v0  ;;  %v712_v3 = vld [vmem:[%s1435_s3 + $0x18] sm:$0xff]  ;;  %v1092_v37 = vmov 2102212464  }
   0x7   :  { %998 = vmatmul.msk.f32.vlgmr.msra.gmra.mxu0 %vm51_vm1, %v48_v1  ;;  %999 = vmatmul.msk.f32.vlgmr.msra.gmra.mxu1 %vm51_vm1, %v49_v2  ;;  %v708_v4 = vld [vmem:[%s1434_s2 + $0x18] sm:$0xff]  ;;  %v711_v5 = vld [vmem:[%s1435_s3 + $0x10] sm:$0xff]  ;;  %v710_v7 = vld [vmem:[%s1435_s3 + $0x8] sm:$0xff]  ;;  %v1093_v39 = vmov 920167782  }
   0x8   :  { %738 = vmatpush.msrb.mxu1 %v712_v3  ;;  %767 = vmatpush.msra.mxu2 %v708_v4  ;;  %v707_v6 = vld [vmem:[%s1434_s2 + $0x10] sm:$0xff]  ;;  %v706_v8 = vld [vmem:[%s1434_s2 + $0x8] sm:$0xff]  ;;  %v709_v9 = vld [vmem:[%s1435_s3] sm:$0xff]  ;;  %v1094_v44 = vmov 683565275  }
   0x9   :  { %843 = vmatpush.msrb.mxu0 %v712_v3  ;;  %v705_v10 = vld [vmem:[%s1434_s2] sm:$0xff]  ;;  %v1095_v46 = vmov 2475754826   ;;  %v1096_v49 = vmov 1326507024   ;;  %s1099_s2 = smov 96  }
   0xa   :  { %739 = vmatpush.msrb.mxu1 %v711_v5  ;;  %768 = vmatpush.msra.mxu2 %v707_v6  ;;  %v1097_v54 = vmov 2131351028  }
   0xb   :  { %844 = vmatpush.msrb.mxu0 %v711_v5 }
   0xc   :  { %740 = vmatpush.msrb.mxu1 %v710_v7  ;;  %769 = vmatpush.msra.mxu2 %v706_v8 }
   0xd   :  { %845 = vmatpush.msrb.mxu0 %v710_v7 }
   0xe   :  { %741 = vmatpush.msrb.mxu1 %v709_v9  ;;  %770 = vmatpush.msra.mxu2 %v705_v10 }
   0xf   :  { %846 = vmatpush.msrb.mxu0 %v709_v9 }
  0x10   :  { %874 = vmatpush.msra.mxu1 %v708_v4 }
  0x12   :  { %875 = vmatpush.msra.mxu1 %v707_v6 }
  0x14   :  { %876 = vmatpush.msra.mxu1 %v706_v8 }
  0x16   :  { %877 = vmatpush.msra.mxu1 %v705_v10 }
  0x84   :  { %v79_v11 = vpop.f32.mrf.mxu0  ;;  %v82_v12 = vpop.f32.mrf.mxu1 }
  0x85   :  { %v1186_v13 = vmul.f32 6.2831855, %v79_v11  ;;  %v1188_v14 = vmul.f32 6.2831855, %v82_v12 }
  0x87   :  { %v90_v15 = vand.u32 2139095040, %v1186_v13  ;;  %v245_v16 = vand.u32 2139095040, %v1188_v14  ;;  %v242_v17 = vand.u32 2147483647, %v1188_v14  ;;  %v87_v18 = vand.u32 2147483647, %v1186_v13 }
  0x89   :  { %v91_v19 = vshrl.u32 %v90_v15, 23  ;;  %v246_v20 = vshrl.u32 %v245_v16, 23  ;;  %v249_v23 = vand.u32 8388607, %v242_v17  ;;  %v94_v24 = vand.u32 8388607, %v87_v18 }
  0x8b   :  { %v1000_v21 = vadd.s32 4294967169, %v91_v19  ;;  %v1003_v22 = vadd.s32 4294967169, %v246_v20  ;;  %v250_v27 = vor.u32 8388608, %v249_v23  ;;  %v95_v30 = vor.u32 8388608, %v94_v24 }
  0x8d   :  { %v97_v25 = vadd.s32 1, %v1000_v21  ;;  %v252_v26 = vadd.s32 1, %v1003_v22  ;;  %v1205_v35 = vshll.u32 %v250_v27, 8  ;;  %v1208_v41 = vshll.u32 %v95_v30, 8 }
  0x8f   :  { %vm98_vm2 = vcmp.gt.s32.totalorder %v97_v25, 0  ;;  %vm253_vm3 = vcmp.gt.s32.totalorder %v252_v26, 0  ;;  %v291_v9 = vand.u32 65535, %v1205_v35  ;;  %v292_v15 = vshrl.u32 %v1205_v35, 16 }
  0x90   :  { %v99_v28 = vsel %vm98_vm2, %v97_v25, 0  ;;  %v254_v29 = vsel %vm253_vm3, %v252_v26, 0 }
  0x91   :  { %v1198_v31 = vand.u32 31, %v99_v28  ;;  %v256_v32 = vand.u32 31, %v254_v29  ;;  %v1200_v33 = vshrl.u32 %v254_v29, 5  ;;  %v1210_v42 = vshrl.u32 %v99_v28, 5 }
  0x93   :  { %v1203_v34 = vsub.s32 32, %v1198_v31  ;;  %v257_v36 = vsub.s32 32, %v256_v32  ;;  %v268_v38 = vshll.u32 %v1092_v37, %v256_v32  ;;  %v271_v40 = vshll.u32 %v1093_v39, %v256_v32 }
  0x94   :  { %v113_v43 = vshll.u32 %v1092_v37, %v1198_v31  ;;  %v259_v45 = vshll.u32 %v1094_v44, %v256_v32  ;;  %v262_v47 = vshll.u32 %v1095_v46, %v256_v32  ;;  %vm277_vm4 = vcmp.lt.s32.totalorder %v1200_v33, 4 }
  0x95   :  { %v269_v48 = vshrl.u32 %v1093_v39, %v257_v36  ;;  %v272_v50 = vshrl.u32 %v1096_v49, %v257_v36  ;;  %v260_v51 = vshrl.u32 %v1095_v46, %v257_v36  ;;  %v114_v52 = vshrl.u32 %v1093_v39, %v1203_v34 }
  0x96   :  { %v117_v53 = vshrl.u32 %v1096_v49, %v1203_v34  ;;  %v263_v55 = vshrl.u32 %v1097_v54, %v257_v36  ;;  %v265_v56 = vshll.u32 %v1097_v54, %v256_v32  ;;  %v266_v60 = vshrl.u32 %v1092_v37, %v257_v36 }
  0x97   :  { %v270_v57 = vor.u32 %v269_v48, %v268_v38  ;;  %v273_v58 = vor.u32 %v272_v50, %v271_v40  ;;  %v261_v59 = vor.u32 %v260_v51, %v259_v45  ;;  %v116_v61 = vshll.u32 %v1093_v39, %v1198_v31 }
  0x98   :  { %v258_v62 = vshrl.u32 %v1094_v44, %v257_v36  ;;  %v264_v63 = vor.u32 %v263_v55, %v262_v47  ;;  %vm274_vm5 = vcmp.lt.s32.totalorder %v1200_v33, 1  ;;  %v267_v2 = vor.u32 %v266_v60, %v265_v56 }
  0x99   :  { %v283_v0 = vsel %vm277_vm4, %v270_v57, 920167782  ;;  %v287_v1 = vsel %vm277_vm4, %v273_v58, 1326507024  ;;  %vm275_vm6 = vcmp.lt.s32.totalorder %v1200_v33, 2  ;;  %v1229_v3 = vor.u32 %v114_v52, %v113_v43 }
  0x9a   :  { %v118_v4 = vor.u32 %v117_v53, %v116_v61  ;;  %vm276_vm7 = vcmp.lt.s32.totalorder %v1200_v33, 3  ;;  %v282_v5 = vsel %vm274_vm5, %v261_v59, %v264_v63  ;;  %v286_v7 = vsel %vm274_vm5, %v264_v63, %v267_v2 }
  0x9b   :  { %v284_v6 = vsel %vm276_vm7, %v267_v2, %v283_v0  ;;  %v288_v8 = vsel %vm276_vm7, %v270_v57, %v287_v1  ;;  %v279_v10 = vsel %vm277_vm4, %v267_v2, 2102212464  ;;  %vm122_vm8 = vcmp.lt.s32.totalorder %v1210_v42, 4 }
  0x9c   :  { %v285_v11 = vsel %vm275_vm6, %v282_v5, %v284_v6  ;;  %v289_v12 = vsel %vm275_vm6, %v286_v7, %v288_v8  ;;  %v128_v21 = vsel %vm122_vm8, %v1229_v3, 920167782  ;;  %v132_v22 = vsel %vm122_vm8, %v118_v4, 1326507024 }
  0x9d   :  { %v293_v16 = vand.u32 65535, %v289_v12  ;;  %v294_v19 = vshrl.u32 %v289_v12, 16  ;;  %v315_v20 = vand.u32 65535, %v285_v11  ;;  %v278_v23 = vsel %vm274_vm5, %v258_v62, %v261_v59 }
  0x9e   :  { %v316_v24 = vshrl.u32 %v285_v11, 16  ;;  %v280_v25 = vsel %vm276_vm7, %v264_v63, %v279_v10  ;;  %v104_v28 = vshll.u32 %v1094_v44, %v1198_v31  ;;  %v105_v32 = vshrl.u32 %v1095_v46, %v1203_v34 }
  0x9f   :  { %v296_v26 = vmul.u32 %v294_v19, %v291_v9  ;;  %v297_v27 = vmul.u32 %v293_v16, %v292_v15  ;;  %v319_v30 = vmul.u32 %v315_v20, %v292_v15  ;;  %v107_v36 = vshll.u32 %v1095_v46, %v1198_v31 }
  0xa0   :  { %v318_v29 = vmul.u32 %v316_v24, %v291_v9  ;;  %v295_v38 = vmul.u32 %v293_v16, %v291_v9  ;;  %v298_v39 = vmul.u32 %v294_v19, %v292_v15  ;;  %v317_v43 = vmul.u32 %v315_v20, %v291_v9 }
  0xa1   :  { %v299_v40 = vshll.u32 %v296_v26, 16  ;;  %v300_v45 = vshrl.u32 %v296_v26, 16  ;;  %v301_v47 = vshll.u32 %v297_v27, 16  ;;  %v320_v48 = vmul.u32 %v316_v24, %v292_v15 }
  0xa2   :  { %v321_v49 = vshll.u32 %v318_v29, 16  ;;  %v323_v51 = vshll.u32 %v319_v30, 16  ;;  %v108_v52 = vshrl.u32 %v1097_v54, %v1203_v34  ;;  %v1098_v53 = vmov 0  }
  0xa3   :  { %vm303_vm9 = vc.u32 %v295_v38, %v299_v40  ;;  %v305_v50 = vadd.s32 %v299_v40, %v295_v38  ;;  %v1265_v46 = vor.u32 %v105_v32, %v104_v28  ;;  %v302_v60 = vshrl.u32 %v297_v27, 16 }
  0xa4   :  { %v304_v55 = vsel %vm303_vm9, 1, %v1098_v53  ;;  %vm325_vm10 = vc.u32 %v317_v43, %v321_v49  ;;  %v327_v56 = vadd.s32 %v321_v49, %v317_v43  ;;  %v1268_v59 = vor.u32 %v108_v52, %v107_v36 }
  0xa5   :  { %v306_v57 = vadd.s32 %v304_v55, %v298_v39  ;;  %vm307_vm11 = vc.u32 %v305_v50, %v301_v47  ;;  %v326_v58 = vsel %vm325_vm10, 1, %v1098_v53  ;;  %v110_v1 = vshll.u32 %v1097_v54, %v1198_v31 }
  0xa6   :  { %v308_v61 = vsel %vm307_vm11, 1, %v1098_v53  ;;  %v328_v62 = vadd.s32 %v326_v58, %v320_v48  ;;  %vm329_vm12 = vc.u32 %v327_v56, %v323_v51  ;;  %v111_v2 = vshrl.u32 %v1092_v37, %v1203_v34 }
  0xa7   :  { %v310_v63 = vadd.s32 %v308_v61, %v306_v57  ;;  %v330_v0 = vsel %vm329_vm12, 1, %v1098_v53  ;;  %v322_v4 = vshrl.u32 %v318_v29, 16  ;;  %vm119_vm13 = vcmp.lt.s32.totalorder %v1210_v42, 1 }
  0xa8   :  { %v332_v5 = vadd.s32 %v330_v0, %v328_v62  ;;  %vm121_vm14 = vcmp.lt.s32.totalorder %v1210_v42, 3  ;;  %v112_v7 = vor.u32 %v111_v2, %v110_v1  ;;  %v127_v8 = vsel %vm119_vm13, %v1265_v46, %v1268_v59 }
  0xa9   :  { %v311_v6 = vadd.s32 %v310_v63, %v300_v45  ;;  %v133_v31 = vsel %vm121_vm14, %v1229_v3, %v132_v22  ;;  %v324_v54 = vshrl.u32 %v319_v30, 16  ;;  %v1285_v9 = vadd.s32 %v327_v56, %v323_v51 }
  0xaa   :  { %v333_v37 = vadd.s32 %v332_v5, %v322_v4  ;;  %vm120_vm15 = vcmp.lt.s32.totalorder %v1210_v42, 2  ;;  %v129_v11 = vsel %vm121_vm14, %v112_v7, %v128_v21  ;;  %v131_v12 = vsel %vm119_vm13, %v1268_v59, %v112_v7 }
  0xab   :  { %v1287_v10 = vadd.s32 %v311_v6, %v302_v60  ;;  %v281_v15 = vsel %vm275_vm6, %v278_v23, %v280_v25  ;;  %v130_v3 = vsel %vm120_vm15, %v127_v8, %v129_v11  ;;  %v134_v19 = vsel %vm120_vm15, %v131_v12, %v133_v31 }
  0xac   :  { %v334_v16 = vadd.s32 %v333_v37, %v324_v54  ;;  %v136_v20 = vand.u32 65535, %v1208_v41  ;;  %v137_v21 = vshrl.u32 %v1208_v41, 16  ;;  %v138_v22 = vand.u32 65535, %v134_v19 }
  0xad   :  { %vm337_vm0 = vc.u32 %v1287_v10, %v1285_v9  ;;  %v139_v26 = vshrl.u32 %v134_v19, 16  ;;  %v160_v27 = vand.u32 65535, %v130_v3  ;;  %v161_v33 = vshrl.u32 %v130_v3, 16 }
  0xae   :  { %v338_v24 = vadd.s32 1, %v334_v16  ;;  %v335_v23 = vmul.u32 %v1205_v35, %v281_v15  ;;  %v142_v29 = vmul.u32 %v138_v22, %v137_v21  ;;  %v140_v36 = vmul.u32 %v138_v22, %v136_v20 }
  0xaf   :  { %v141_v28 = vmul.u32 %v139_v26, %v136_v20  ;;  %v163_v32 = vmul.u32 %v161_v33, %v136_v20  ;;  %v164_v39 = vmul.u32 %v160_v27, %v137_v21  ;;  %v143_v43 = vmul.u32 %v139_v26, %v137_v21 }
  0xb0   :  { %v339_v25 = vsel %vm337_vm0, %v338_v24, %v334_v16  ;;  %v162_v45 = vmul.u32 %v160_v27, %v136_v20  ;;  %v146_v48 = vshll.u32 %v142_v29, 16  ;;  %v165_v50 = vmul.u32 %v161_v33, %v137_v21 }
  0xb1   :  { %v340_v30 = vadd.s32 %v339_v25, %v335_v23  ;;  %v144_v38 = vshll.u32 %v141_v28, 16  ;;  %v166_v47 = vshll.u32 %v163_v32, 16  ;;  %v168_v56 = vshll.u32 %v164_v39, 16 }
  0xb2   :  { %v124_v62 = vsel %vm122_vm8, %v112_v7, 2102212464  ;;  %v145_v63 = vshrl.u32 %v141_v28, 16  ;;  %v103_v2 = vshrl.u32 %v1094_v44, %v1203_v34  ;;  %v147_v5 = vshrl.u32 %v142_v29, 16 }
  0xb3   :  { %v341_v40 = vadd.s32 536870912, %v340_v30  ;;  %vm148_vm1 = vc.u32 %v140_v36, %v144_v38  ;;  %v150_v49 = vadd.s32 %v144_v38, %v140_v36  ;;  %vm170_vm2 = vc.u32 %v162_v45, %v166_v47 }
  0xb4   :  { %v149_v35 = vsel %vm148_vm1, 1, %v1098_v53  ;;  %v172_v52 = vadd.s32 %v166_v47, %v162_v45  ;;  %v171_v57 = vsel %vm170_vm2, 1, %v1098_v53  ;;  %v167_v8 = vshrl.u32 %v163_v32, 16 }
  0xb5   :  { %v1306_v51 = vshrl.u32 %v341_v40, 30  ;;  %v151_v55 = vadd.s32 %v149_v35, %v143_v43  ;;  %vm152_vm3 = vc.u32 %v150_v49, %v146_v48  ;;  %v173_v61 = vadd.s32 %v171_v57, %v165_v50 }
  0xb6   :  { %v153_v60 = vsel %vm152_vm3, 1, %v1098_v53  ;;  %vm174_vm4 = vc.u32 %v172_v52, %v168_v56  ;;  %v123_v37 = vsel %vm119_vm13, %v103_v2, %v1265_v46  ;;  %v125_v7 = vsel %vm121_vm14, %v1268_v59, %v124_v62 }
  0xb7   :  { %v343_v58 = vshll.u32 %v1306_v51, 30  ;;  %v155_v0 = vadd.s32 %v153_v60, %v151_v55  ;;  %v175_v4 = vsel %vm174_vm4, 1, %v1098_v53  ;;  %v169_v12 = vshrl.u32 %v164_v39, 16 }
  0xb8   :  { %v177_v31 = vadd.s32 %v175_v4, %v173_v61  ;;  %v176_v44 = vadd.s32 %v172_v52, %v168_v56  ;;  %v126_v16 = vsel %vm120_vm15, %v123_v37, %v125_v7  ;;  %v336_v59 = vadd.s32 %v1285_v9, %v1287_v10 }
  0xb9   :  { %v344_v1 = vsub.s32 %v340_v30, %v343_v58  ;;  %v156_v6 = vadd.s32 %v155_v0, %v145_v63  ;;  %v180_v21 = vmul.u32 %v1208_v41, %v126_v16  ;;  %vm244_vm9 = vcmp.lt.s32.totalorder %v1188_v14, 0 }
  0xba   :  { %v178_v15 = vadd.s32 %v177_v31, %v167_v8  ;;  %vm1334_vm10 = vcmp.le.f32.partialorder %v242_v17, 0.7853982  ;;  %v366_v52 = vsub.s32 4, %v1306_v51  ;;  %vm1351_vm13 = vcmp.le.f32.partialorder %v87_v18, 0.7853982 }
  0xbb   :  { %vm345_vm5 = vcmp.lt.s32.totalorder %v344_v1, 0  ;;  %v346_v54 = vsub.s32 0, %v344_v1  ;;  %v157_v11 = vadd.s32 %v156_v6, %v147_v5  ;;  %vm89_vm14 = vcmp.lt.s32.totalorder %v1186_v13, 0 }
  0xbc   :  { %v179_v3 = vadd.s32 %v178_v15, %v169_v12  ;;  %v367_v2 = vsel %vm244_vm9, %v366_v52, %v1306_v51  ;;  %vm385_vm1 = vweird.f32 %v1188_v14 }
  0xbd   :  { %v347_v34 = vsel %vm345_vm5, %v346_v54, %v344_v1  ;;  %vm182_vm6 = vc.u32 %v157_v11, %v176_v44  ;;  %v181_v58 = vadd.s32 %v176_v44, %v157_v11  ;;  %v369_v37 = vsel %vm1334_vm10, 0, %v367_v2 }
  0xbe   :  { %v348_v53 = vclz %v347_v34  ;;  %v183_v20 = vadd.s32 1, %v179_v3  ;;  %v695_v16 = vand.u32 3, %v369_v37 }
  0xc0   :  { %v1004_v19 = vadd.s32 4294967294, %v348_v53  ;;  %v184_v46 = vsel %vm182_vm6, %v183_v20, %v179_v3  ;;  %vm696_vm12 = vcmp.lt.s32.totalorder %v695_v16, 2  ;;  %vm697_vm15 = vcmp.eq.s32.totalorder %v695_v16, 0 }
  0xc1   :  { %v185_v24 = vadd.s32 %v184_v46, %v180_v21  ;;  %vm700_vm0 = vcmp.eq.s32.totalorder %v695_v16, 2 }
  0xc2   :  { %vm1005_vm7 = vcmp.lt.s32.totalorder %v1004_v19, 0 }
  0xc3   :  { %v351_v22 = vsel %vm1005_vm7, 0, %v1004_v19  ;;  %v186_v33 = vadd.s32 536870912, %v185_v24  ;;  %v386_v19 = vadd.s32 3, %v369_v37 }
  0xc4   :  { %v352_v26 = vsub.s32 32, %v351_v22  ;;  %v356_v27 = vsub.s32 4294967266, %v351_v22  ;;  %v353_v23 = vshll.u32 %v344_v1, %v351_v22  ;;  %v820_v22 = vld [vmem:[%s1439_s7 + $0x8] sm:$0xff] }
  0xc5   :  { %v1328_v28 = vshrl.u32 %v186_v33, 30 }
  0xc6   :  { %v354_v25 = vshrl.u32 %v336_v59, %v352_v26  ;;  %v357_v42 = vadd.s32 127, %v356_v27  ;;  %v387_v59 = vand.u32 3, %v386_v19 }
  0xc7   :  { %v188_v32 = vshll.u32 %v1328_v28, 30  ;;  %v211_v33 = vsub.s32 4, %v1328_v28 }
  0xc8   :  { %v355_v29 = vor.u32 %v354_v25, %v353_v23  ;;  %v358_v30 = vshll.u32 %v357_v42, 23  ;;  %vm389_vm2 = vcmp.eq.s32.totalorder %v387_v59, 0  ;;  %vm392_vm3 = vcmp.eq.s32.totalorder %v387_v59, 2 }
  0xc9   :  { %v189_v36 = vsub.s32 %v185_v24, %v188_v32  ;;  %v212_v32 = vsel %vm89_vm14, %v211_v33, %v1328_v28  ;;  %vm388_vm4 = vcmp.lt.s32.totalorder %v387_v59, 2 }
  0xca   :  { %v359_v41 = vor.u32 4788187, %v358_v30  ;;  %v362_v39 = vcvt.s32.f32 %v355_v29 }
  0xcb   :  { %vm190_vm8 = vcmp.lt.s32.totalorder %v189_v36, 0  ;;  %v191_v40 = vsub.s32 0, %v189_v36 }
  0xcc   :  { %v360_v38 = vand.u32 2147483647, %v359_v41 }
  0xcd   :  { %v192_v9 = vsel %vm190_vm8, %v191_v40, %v189_v36  ;;  %v214_v40 = vsel %vm1351_vm13, 0, %v212_v32  ;;  %vm719_vm8 = vcmask 261120  }
  0xce   :  { %v363_v43 = vmul.f32 %v362_v39, %v360_v38  ;;  %v193_v45 = vclz %v192_v9 }
  0xd0   :  { %v364_v10 = vxor.u32 2147483648, %v363_v43  ;;  %v1001_v49 = vadd.s32 4294967294, %v193_v45 }
  0xd2   :  { %v365_v48 = vsel %vm244_vm9, %v364_v10, %v363_v43  ;;  %vm1002_vm11 = vcmp.lt.s32.totalorder %v1001_v49, 0 }
  0xd3   :  { %v368_v50 = vsel %vm1334_vm10, %v1188_v14, %v365_v48  ;;  %v196_v55 = vsel %vm1002_vm11, 0, %v1001_v49  ;;  %v231_v48 = vadd.s32 3, %v214_v40 }
  0xd4   :  { %v370_v35 = vmul.f32 %v368_v50, %v368_v50  ;;  %v197_v17 = vsub.s32 32, %v196_v55  ;;  %v201_v60 = vsub.s32 4294967266, %v196_v55  ;;  %v198_v0 = vshll.u32 %v189_v36, %v196_v55 }
  0xd5   :  { %v541_v55 = vand.u32 3, %v214_v40 }
  0xd6   :  { %v371_v56 = vmul.f32 -0.001358992, %v370_v35  ;;  %v378_v57 = vmul.f32 -0.00019511016, %v370_v35  ;;  %v199_v63 = vshrl.u32 %v181_v58, %v197_v17  ;;  %v202_v1 = vadd.s32 127, %v201_v60 }
  0xd7   :  { %vm542_vm5 = vcmp.lt.s32.totalorder %v541_v55, 2  ;;  %vm543_vm6 = vcmp.eq.s32.totalorder %v541_v55, 0  ;;  %vm546_vm7 = vcmp.eq.s32.totalorder %v541_v55, 2  ;;  %v1046_v55 = vld [vmem:[%s1440_s8] ss:$0 sm:$0xff] }
  0xd8   :  { %v372_v61 = vadd.f32 0.041655596, %v371_v56  ;;  %v379_v62 = vadd.f32 0.008332121, %v378_v57  ;;  %v200_v6 = vor.u32 %v199_v63, %v198_v0  ;;  %v203_v8 = vshll.u32 %v202_v1, 23 }
  0xd9   :  { %v232_v56 = vand.u32 3, %v231_v48 }
  0xda   :  { %v373_v4 = vmul.f32 %v372_v61, %v370_v35  ;;  %v380_v5 = vmul.f32 %v379_v62, %v370_v35  ;;  %v204_v7 = vor.u32 4788187, %v203_v8  ;;  %v207_v34 = vcvt.s32.f32 %v200_v6  ;;  %v714_v6 = vld [vmem:[#allocation2] sm:$0xff] }
  0xdb   :  { %vm233_vm9 = vcmp.lt.s32.totalorder %v232_v56, 2  ;;  %vm234_vm10 = vcmp.eq.s32.totalorder %v232_v56, 0  ;;  %vm237_vm11 = vcmp.eq.s32.totalorder %v232_v56, 2 }
  0xdc   :  { %v374_v31 = vadd.f32 -0.4999988, %v373_v4  ;;  %v381_v54 = vadd.f32 -0.16666654, %v380_v5  ;;  %v205_v15 = vand.u32 2147483647, %v204_v7 }
  0xdd   :  { %v717_v4 = vld [vmem:[#allocation2 + $0x18] sm:$0xff]  ;;  %v716_v5 = vld [vmem:[#allocation2 + $0x10] sm:$0xff] }
  0xde   :  { %v375_v11 = vmul.f32 %v374_v31, %v370_v35  ;;  %v382_v12 = vmul.f32 %v381_v54, %v370_v35  ;;  %v208_v3 = vmul.f32 %v207_v34, %v205_v15  ;;  %806 = vmatpush.msra.mxu3 %v717_v4  ;;  %907 = vmatpush.msrb.mxu2 %v717_v4 }
  0xe0   :  { %v376_v44 = vadd.f32 1.0, %v375_v11  ;;  %v383_v53 = vadd.f32 1.0, %v382_v12  ;;  %v209_v21 = vxor.u32 2147483648, %v208_v3  ;;  %807 = vmatpush.msra.mxu3 %v716_v5  ;;  %908 = vmatpush.msrb.mxu2 %v716_v5  ;;  %v1044_v11 = vld [vmem:[%s1436_s4] ss:$0 sm:$0xff] }
  0xe2   :  { %v384_v51 = vmul.f32 %v383_v53, %v368_v50  ;;  %v393_v20 = vxor.u32 2147483648, %v376_v44  ;;  %v210_v24 = vsel %vm89_vm14, %v209_v21, %v208_v3 }
  0xe3   :  { %v213_v23 = vsel %vm1351_vm13, %v1186_v13, %v210_v24  ;;  %vm989_vm13 = vcmask 64512  }
  0xe4   :  { %v390_v46 = vxor.u32 2147483648, %v384_v51  ;;  %v702_v27 = vsel %vm700_vm0, %v393_v20, %v384_v51  ;;  %v215_v25 = vmul.f32 %v213_v23, %v213_v23  ;;  %v394_v39 = vsel %vm392_vm3, %v393_v20, %v384_v51  ;;  %v822_v20 = vld [vmem:[%s1439_s7 + $0x18] sm:$0xff] }
  0xe5   :  { %972 = vmatpush.msra.mxu0 %v822_v20 }
  0xe6   :  { %v699_v26 = vsel %vm697_vm15, %v376_v44, %v390_v46  ;;  %v216_v29 = vmul.f32 -0.001358992, %v215_v25  ;;  %v223_v30 = vmul.f32 -0.00019511016, %v215_v25  ;;  %v391_v41 = vsel %vm389_vm2, %v376_v44, %v390_v46  ;;  %v821_v46 = vld [vmem:[%s1439_s7 + $0x10] sm:$0xff] }
  0xe7   :  { %v703_v18 = vsel %vm696_vm12, %v699_v26, %v702_v27  ;;  %v395_v10 = vsel %vm388_vm4, %v391_v41, %v394_v39  ;;  %vm230_vm12 = vweird.f32 %v1186_v13  ;;  %v715_v13 = vld [vmem:[#allocation2 + $0x8] sm:$0xff]  ;;  %973 = vmatpush.msra.mxu0 %v821_v46  ;;  %v819_v27 = vld [vmem:[%s1439_s7] sm:$0xff] }
  0xe8   :  { %v704_v42 = vsel %vm385_vm1, nan, %v703_v18  ;;  %v217_v36 = vadd.f32 0.041655596, %v216_v29  ;;  %v224_v38 = vadd.f32 0.008332121, %v223_v30  ;;  %v396_v49 = vsel %vm385_vm1, nan, %v395_v10  ;;  %808 = vmatpush.msra.mxu3 %v715_v13  ;;  %909 = vmatpush.msrb.mxu2 %v715_v13 }
  0xe9   :  { %825 = vrot.lane.b32.xlu1 %v704_v42, %s1099_s2  ;;  %974 = vmatpush.msra.mxu0 %v820_v22  ;;  %v1027_v29 = vld [vmem:[%s1439_s7 + $0x38] sm:$0xff]  ;;  %v1026_v30 = vld [vmem:[%s1439_s7 + $0x30] sm:$0xff]  ;;  %v1045_v41 = vld [vmem:[%s1438_s6] ss:$0 sm:$0xff] }
  0xea   :  { %v218_v43 = vmul.f32 %v217_v36, %v215_v25  ;;  %v225_v9 = vmul.f32 %v224_v38, %v215_v25  ;;  %809 = vmatpush.msra.mxu3 %v714_v6  ;;  %910 = vmatpush.msrb.mxu2 %v714_v6  ;;  %v1025_v10 = vld [vmem:[%s1439_s7 + $0x28] sm:$0xff] }
  0xeb   :  { %975 = vmatpush.msra.mxu0 %v819_v27 }
  0xec   :  { %v219_v45 = vadd.f32 -0.4999988, %v218_v43  ;;  %v226_v47 = vadd.f32 -0.16666654, %v225_v9  ;;  %943 = vmatpush.msrb.mxu3 %v1027_v29 }
  0xee   :  { %v220_v50 = vmul.f32 %v219_v45, %v215_v25  ;;  %v227_v28 = vmul.f32 %v226_v47, %v215_v25  ;;  %944 = vmatpush.msrb.mxu3 %v1026_v30  ;;  %v1024_v45 = vld [vmem:[%s1439_s7 + $0x20] sm:$0xff] }
  0xf0   :  { %v221_v35 = vadd.f32 1.0, %v220_v50  ;;  %v228_v52 = vadd.f32 1.0, %v227_v28  ;;  %945 = vmatpush.msrb.mxu3 %v1025_v10 }
  0xf1   :  { %856 = vrot.lane.b32.xlu1 %v396_v49, %s1099_s2 }
  0xf2   :  { %v229_v57 = vmul.f32 %v228_v52, %v213_v23  ;;  %v238_v58 = vxor.u32 2147483648, %v221_v35  ;;  %946 = vmatpush.msrb.mxu3 %v1024_v45 }
  0xf4   :  { %v235_v17 = vxor.u32 2147483648, %v229_v57  ;;  %v548_v60 = vsel %vm546_vm7, %v238_v58, %v229_v57  ;;  %v239_v62 = vsel %vm237_vm11, %v238_v58, %v229_v57 }
  0xf6   :  { %v545_v14 = vsel %vm543_vm6, %v221_v35, %v235_v17  ;;  %v236_v61 = vsel %vm234_vm10, %v221_v35, %v235_v17 }
  0xf7   :  { %v549_v63 = vsel %vm542_vm5, %v545_v14, %v548_v60  ;;  %v240_v0 = vsel %vm233_vm9, %v236_v61, %v239_v62 }
  0xf8   :  { %v550_v1 = vsel %vm230_vm12, nan, %v549_v63  ;;  %v241_v2 = vsel %vm230_vm12, nan, %v240_v0 }
  0xf9   :  { %823 = vrot.lane.b32.xlu0 %v550_v1, %s1099_s2  ;;  %1012 = vmatmul.msk.f32.vlgmr.msrb.gmra.mxu1 %vm719_vm8, %v550_v1 }
  0xfa   :  { %1014 = vmatmul.msk.f32.vlgmr.msra.gmra.mxu2 %vm719_vm8, %v241_v2 }
 0x101   :  { %1013 = vmatmul.msk.f32.gmra.mxu1 %vm719_vm8, %v704_v42  ;;  %854 = vrot.lane.b32.xlu0 %v241_v2, %s1099_s2 }
 0x102   :  { %1015 = vmatmul.msk.f32.gmra.mxu2 %vm719_vm8, %v396_v49 }
 0x15b   :  { %v826_v31 = vpop.permute.xlu1 %825 }
 0x163   :  { %v857_v37 = vpop.permute.xlu1 %856 }
 0x16b   :  { %v824_v8 = vpop.permute.xlu0 %823 }
 0x16c   :  { %1018 = vmatmul.msk.f32.vlgmr.msrb.gmra.mxu0 %vm719_vm8, %v824_v8 }
 0x173   :  { %v855_v54 = vpop.permute.xlu0 %854 }
 0x174   :  { %1019 = vmatmul.msk.f32.gmra.mxu0 %vm719_vm8, %v826_v31  ;;  %1020 = vmatmul.msk.f32.vlgmr.msra.gmra.mxu1 %vm719_vm8, %v855_v54 }
 0x176   :  { %v743_v7 = vpop.f32.mrf.mxu1 }
 0x17c   :  { %1021 = vmatmul.msk.f32.gmra.mxu1 %vm719_vm8, %v857_v37 }
 0x17d   :  { %v772_v12 = vpop.f32.mrf.mxu2 }
 0x17e   :  { %v773_v15 = vadd.f32 %v772_v12, %v743_v7  ;;  %v746_v44 = vpop.f32.mrf.mxu1 }
 0x180   :  { %v781_v34 = vadd.f32 %v1044_v11, %v773_v15 }
 0x182   :  { %1047 = vtanh.f32 %v781_v34 }
 0x185   :  { %v775_v53 = vpop.f32.mrf.mxu2 }
 0x186   :  { %v776_v16 = vadd.f32 %v775_v53, %v746_v44 }
 0x188   :  { %v1048_v3 = vpop.eup %1047  ;;  %v782_v19 = vadd.f32 %v1044_v11, %v776_v16 }
 0x189   :  { %1016 = vmatmul.msk.f32.vlgmr.msra.gmra.mxu3 %vm719_vm8, %v1048_v3 }
 0x18a   :  { %1049 = vtanh.f32 %v782_v19 }
 0x190   :  { %v1050_v51 = vpop.eup %1049 }
 0x191   :  { %1017 = vmatmul.msk.f32.gmra.mxu3 %vm719_vm8, %v1050_v51 }
 0x1e9   :  { %v848_v21 = vpop.f32.mrf.mxu0 }
 0x1f1   :  { %v879_v24 = vpop.f32.mrf.mxu1  ;;  %v851_v33 = vpop.f32.mrf.mxu0 }
 0x1f2   :  { %v880_v59 = vadd.f32 %v879_v24, %v848_v21 }
 0x1f4   :  { %v885_v26 = vadd.f32 %v1044_v11, %v880_v59 }
 0x1f6   :  { %1051 = vtanh.f32 %v885_v26 }
 0x1f9   :  { %v882_v23 = vpop.f32.mrf.mxu1 }
 0x1fa   :  { %v883_v18 = vadd.f32 %v882_v23, %v851_v33 }
 0x1fc   :  { %v1052_v25 = vpop.eup %1051  ;;  %v886_v42 = vadd.f32 %v1044_v11, %v883_v18 }
 0x1fd   :  { %1022 = vmatmul.msk.f32.vlgmr.msrb.gmra.mxu2 %vm719_vm8, %v1052_v25 }
 0x1fe   :  { %1053 = vtanh.f32 %v886_v42 }
 0x204   :  { %v1054_v32 = vpop.eup %1053 }
 0x205   :  { %1023 = vmatmul.msk.f32.gmra.mxu2 %vm719_vm8, %v1054_v32 }
 0x20c   :  { %v811_v36 = vpop.f32.mrf.mxu3 }
 0x20d   :  { %v812_v38 = vadd.f32 %v1045_v41, %v811_v36 }
 0x20f   :  { %1055 = vtanh.f32 %v812_v38 }
 0x214   :  { %v814_v39 = vpop.f32.mrf.mxu3 }
 0x215   :  { %v1056_v40 = vpop.eup %1055  ;;  %v815_v43 = vadd.f32 %v1045_v41, %v814_v39 }
 0x216   :  { %1030 = vmatmul.msk.f32.vlgmr.msra.gmra.mxu0 %vm719_vm8, %v1056_v40 }
 0x217   :  { %1057 = vtanh.f32 %v815_v43 }
 0x21d   :  { %v1058_v9 = vpop.eup %1057 }
 0x21e   :  { %1031 = vmatmul.msk.f32.gmra.mxu0 %vm719_vm8, %v1058_v9 }
 0x280   :  { %v912_v47 = vpop.f32.mrf.mxu2 }
 0x281   :  { %v913_v48 = vadd.f32 %v1045_v41, %v912_v47 }
 0x283   :  { %1059 = vtanh.f32 %v913_v48 }
 0x288   :  { %v915_v49 = vpop.f32.mrf.mxu2 }
 0x289   :  { %v1060_v50 = vpop.eup %1059  ;;  %v916_v28 = vadd.f32 %v1045_v41, %v915_v49 }
 0x28a   :  { %1028 = vmatmul.msk.f32.vlgmr.msrb.gmra.mxu3 %vm719_vm8, %v1060_v50 }
 0x28b   :  { %1061 = vtanh.f32 %v916_v28 }
 0x291   :  { %v1062_v35 = vpop.eup %1061 }
 0x292   :  { %1029 = vmatmul.msk.f32.gmra.mxu3 %vm719_vm8, %v1062_v35 }
 0x293   :  { %v977_v52 = vpop.f32.mrf.mxu0 }
 0x29b   :  { %v980_v17 = vpop.f32.mrf.mxu0 }
 0x30d   :  { %v948_v56 = vpop.f32.mrf.mxu3 }
 0x30e   :  { %v978_v57 = vadd.f32 %v977_v52, %v948_v56 }
 0x310   :  { %v987_v58 = vadd.f32 %v1046_v55, %v978_v57 }
 0x312   :  { %990 = vst.msk [vmem:[%s1441_s9] sm:$0xff] %vm989_vm13, %v987_v58 }
 0x315   :  { %v951_v14 = vpop.f32.mrf.mxu3 }
 0x316   :  { %v981_v60 = vadd.f32 %v980_v17, %v951_v14 }
 0x318   :  { %v988_v61 = vadd.f32 %v1046_v55, %v981_v60 }
 0x31a   :  { %991 = vst.msk [vmem:[%s1441_s9 + $0x8] sm:$0xff] %vm989_vm13, %v988_v61 }
 0x31b   :  { %996 = vsyncpa [#allocation3], 1 }

</bundles_post_ra>
